<compile_context>
chip_gen: v6e
topology: v6e:2x2x1
jax: 0.10.0
libtpu: 0.0.40
codegen_flags: <defaults>
</compile_context>

<pallas_src>
import math

import jax
import jax.numpy as jnp
from jax.experimental import pallas as pl
from jax.experimental.pallas import tpu as pltpu


def _deepfm_compute(deep, first, second_flat, sel, w1, b1, w2, b2,
                    wf_deep, wf_first, wf_second, bfb):
    """Shared math. Matmul inputs are in the compute dtype, accumulation f32."""
    f32 = jnp.float32
    cd = w1.dtype  # compute (matmul input) dtype

    # ---- FM second-order term; the sum over fields runs on the MXU:
    #   s_sum[b, k]    = sum_f second[b, f, k]    = second_flat @ sel
    #   s_sq_sum[b, k] = sum_f second[b, f, k]^2  = (second_flat * second_flat) @ sel
    s_sum = jnp.dot(second_flat, sel, preferred_element_type=f32)
    s_sq_sum = jnp.dot(second_flat * second_flat, sel, preferred_element_type=f32)
    second_order = 0.5 * (s_sum * s_sum - s_sq_sum)            # (TB, K) f32

    # ---- Deep MLP: deep_dim -> H1 -> H2, ReLU activations.
    h = jnp.dot(deep, w1, preferred_element_type=f32) + b1
    h = jnp.maximum(h, 0.0)
    h = jnp.dot(h.astype(cd), w2, preferred_element_type=f32) + b2
    deep_dense = jnp.maximum(h, 0.0)                           # (TB, H2) f32

    # ---- Final linear on concat([deep_dense, first, second_order]), written
    # as three matmuls against the pre-split Wf (mathematically identical).
    y = jnp.dot(deep_dense.astype(cd), wf_deep, preferred_element_type=f32)
    y = y + jnp.dot(first, wf_first, preferred_element_type=f32)
    y = y + jnp.dot(second_order.astype(cd), wf_second, preferred_element_type=f32)
    y = y + bfb
    return jax.nn.sigmoid(y)


def deepfm_kernel_split(deep_ref, first_ref, second_ref, sel_ref,
                        w1_ref, b1_ref, w2_ref, b2_ref,
                        wfd_ref, wff_ref, wfs_ref, bf_ref, out_ref):
    y = _deepfm_compute(deep_ref[...], first_ref[...], second_ref[...], sel_ref[...],
                        w1_ref[...], b1_ref[...], w2_ref[...], b2_ref[...],
                        wfd_ref[...], wff_ref[...], wfs_ref[...], bf_ref[...])
    out_ref[...] = y.astype(out_ref.dtype)


def deepfm_kernel_shared(deep_ref, first_ref, sel_ref,
                         w1_ref, b1_ref, w2_ref, b2_ref,
                         wfd_ref, wff_ref, wfs_ref, bf_ref, out_ref):
    # deep_term and second_order_emb are the same embeddings -> one HBM stream.
    x = deep_ref[...]
    y = _deepfm_compute(x, first_ref[...], x, sel_ref[...],
                        w1_ref[...], b1_ref[...], w2_ref[...], b2_ref[...],
                        wfd_ref[...], wff_ref[...], wfs_ref[...], bf_ref[...])
    out_ref[...] = y.astype(out_ref.dtype)


def _round_up(x, m):
    return (x + m - 1) // m * m


def deepfm_forward(deep_term, first_order_emb, second_order_emb, params,
                   *, tile_b=256, compute_dtype=jnp.bfloat16,
                   share_embeddings=None):
    """DeepFm forward pass as a single Pallas kernel tiled over the batch.

    share_embeddings: if True (or None and deep_term is second_order_emb),
    the duplicated (B, F, K) second-order stream is dropped and the FM term
    is computed from the deep input, halving HBM read traffic.
    """
    # PyTorch forward accepts lists of per-field embeddings; mirror that.
    if isinstance(first_order_emb, (list, tuple)):
        first_order_emb = jnp.stack(first_order_emb, axis=1)
    if isinstance(second_order_emb, (list, tuple)):
        second_order_emb = jnp.stack(second_order_emb, axis=1)

    B, F, K = second_order_emb.shape
    if share_embeddings is None:
        share_embeddings = deep_term is second_order_emb

    w1, b1, w2, b2, wf, bf = params
    H1, H2 = w1.shape[1], w2.shape[1]
    OUT = wf.shape[1]

    cd = jnp.dtype(compute_dtype)
    deep_flat = deep_term.reshape(B, -1).astype(cd)
    deep_dim = deep_flat.shape[1]
    first = first_order_emb.astype(cd)
    second_flat = (None if share_embeddings
                   else second_order_emb.reshape(B, F * K).astype(cd))

    # ---- batch tiling: >=128 rows per grid step; pad the batch with zeros.
    tile_b = max(128, min(_round_up(tile_b, 128), _round_up(B, 128)))
    B_pad = _round_up(B, tile_b)
    if B_pad != B:
        pad_rows = ((0, B_pad - B), (0, 0))
        deep_flat = jnp.pad(deep_flat, pad_rows)
        first = jnp.pad(first, pad_rows)
        if second_flat is not None:
            second_flat = jnp.pad(second_flat, pad_rows)

    # ---- lane-dense output: pad OUT to a multiple of 128, slice afterwards.
    OUT_P = _round_up(OUT, 128)

    # ---- weights: pre-split Wf, pad its columns, cast matmul operands to the
    # compute dtype; biases stay f32 (added to the f32 accumulators).
    sel = jnp.tile(jnp.eye(K, dtype=jnp.float32), (F, 1)).astype(cd)     # (F*K, K)
    pad_cols = ((0, 0), (0, OUT_P - OUT))
    wf_deep = jnp.pad(wf[:H2], pad_cols).astype(cd)
    wf_first = jnp.pad(wf[H2:H2 + F], pad_cols).astype(cd)
    wf_second = jnp.pad(wf[H2 + F:H2 + F + K], pad_cols).astype(cd)
    bf_p = jnp.pad(bf.astype(jnp.float32), pad_cols)
    w1c, w2c = w1.astype(cd), w2.astype(cd)
    b1f, b2f = b1.astype(jnp.float32), b2.astype(jnp.float32)

    grid = (B_pad // tile_b,)

    def row_spec(cols):
        return pl.BlockSpec((tile_b, cols), lambda i: (i, 0))

    # Weights/biases use constant index maps, so their blocks stay resident
    # across the (parallel) batch grid. (pipeline_mode=pl.Buffered(1) would
    # additionally drop their second pipeline buffer; left at the default.)
    def const_spec(r, c):
        return pl.BlockSpec((r, c), lambda i: (0, 0))

    weight_operands = (sel, w1c, b1f, w2c, b2f, wf_deep, wf_first, wf_second, bf_p)
    weight_specs = [
        const_spec(F * K, K),
        const_spec(deep_dim, H1), const_spec(1, H1),
        const_spec(H1, H2), const_spec(1, H2),
        const_spec(H2, OUT_P), const_spec(F, OUT_P), const_spec(K, OUT_P),
        const_spec(1, OUT_P),
    ]

    if share_embeddings:
        kernel = deepfm_kernel_shared
        operands = (deep_flat, first) + weight_operands
        act_specs = [row_spec(deep_dim), row_spec(F)]
    else:
        kernel = deepfm_kernel_split
        operands = (deep_flat, first, second_flat) + weight_operands
        act_specs = [row_spec(deep_dim), row_spec(F), row_spec(F * K)]

    # ---- VMEM budget: double-buffered activations + output + weights; give
    # headroom, cap at 48 MiB so it is also safe on v7x's 64 MiB VMEM.
    act_cols = deep_dim + F + (0 if share_embeddings else F * K)
    act_bytes = 2 * tile_b * act_cols * cd.itemsize
    out_bytes = 2 * tile_b * OUT_P * 4
    w_bytes = 2 * sum(math.prod(o.shape) * o.dtype.itemsize for o in weight_operands)
    vmem_limit = int(min(48 * 2 ** 20,
                         max(32 * 2 ** 20, 3 * (act_bytes + out_bytes + w_bytes))))

    out = pl.pallas_call(
        kernel,
        out_shape=jax.ShapeDtypeStruct((B_pad, OUT_P), jnp.float32),
        grid_spec=pltpu.PrefetchScalarGridSpec(
            num_scalar_prefetch=0,
            grid=grid,
            in_specs=act_specs + weight_specs,
            out_specs=pl.BlockSpec((tile_b, OUT_P), lambda i: (i, 0)),
        ),
        compiler_params=pltpu.CompilerParams(
            dimension_semantics=("parallel",),
            vmem_limit_bytes=vmem_limit),
    )(*operands)

    return out[:B, :OUT]


def deepfm_reference(deep_term, first_order_emb, second_order_emb, params):
    """Pure-JAX reference mirroring the PyTorch forward (f32)."""
    w1, b1, w2, b2, wf, bf = params
    s = jnp.sum(second_order_emb, axis=1)
    ss = jnp.sum(second_order_emb ** 2, axis=1)
    second_order = 0.5 * (s ** 2 - ss)
    x = deep_term.reshape(deep_term.shape[0], -1)
    h = jnp.maximum(x @ w1 + b1[0], 0.0)
    h = jnp.maximum(h @ w2 + b2[0], 0.0)
    concat = jnp.concatenate([h, first_order_emb, second_order], axis=1)
    return jax.nn.sigmoid(concat @ wf + bf[0])


if __name__ == "__main__":
    # Module hyperparameters (F == embedding_dim so fm_linear's in_features
    # = embedding_dim*2 + hidden[-1] lines up with the concat).
    K = 8                 # embedding_dim
    F = 8                 # number of fields (== embedding_dim)
    B = 16                # batch
    DEEP_DIM = F * K      # 64
    H1, H2 = 32, 16       # mlp_hidden_layers
    OUT = 8               # linear_out_features

    key = jax.random.PRNGKey(0)
    keys = jax.random.split(key, 9)

    deep_term = jax.random.normal(keys[0], (B, F, K), dtype=jnp.float32)
    first_order_emb = jax.random.normal(keys[1], (B, F), dtype=jnp.float32)
    second_order_emb = jax.random.normal(keys[2], (B, F, K), dtype=jnp.float32)

    w1 = 0.1 * jax.random.normal(keys[3], (DEEP_DIM, H1), dtype=jnp.float32)
    b1 = 0.1 * jax.random.normal(keys[4], (1, H1), dtype=jnp.float32)
    w2 = 0.1 * jax.random.normal(keys[5], (H1, H2), dtype=jnp.float32)
    b2 = 0.1 * jax.random.normal(keys[6], (1, H2), dtype=jnp.float32)
    wf = 0.1 * jax.random.normal(keys[7], (H2 + F + K, OUT), dtype=jnp.float32)
    bf = 0.1 * jax.random.normal(keys[8], (1, OUT), dtype=jnp.float32)
    params = (w1, b1, w2, b2, wf, bf)

    # 1) f32 compute path, distinct deep / second-order streams: tight check.
    ref = deepfm_reference(deep_term, first_order_emb, second_order_emb, params)
    out_f32 = deepfm_forward(deep_term, first_order_emb, second_order_emb,
                             params, compute_dtype=jnp.float32)
    out_f32 = jax.block_until_ready(out_f32)
    assert out_f32.shape == (B, OUT)
    assert jnp.allclose(out_f32, ref, atol=1e-4, rtol=1e-4), "f32 kernel mismatch"

    # 2) bf16 compute path with the shared-embedding single-stream kernel
    # (the realistic DeepFM configuration): looser tolerance for bf16 matmuls.
    ref_shared = deepfm_reference(second_order_emb, first_order_emb,
                                  second_order_emb, params)
    out_bf16 = deepfm_forward(second_order_emb, first_order_emb, second_order_emb,
                              params, compute_dtype=jnp.bfloat16)
    out_bf16 = jax.block_until_ready(out_bf16)
    assert out_bf16.shape == (B, OUT)
    assert jnp.allclose(out_bf16, ref_shared, atol=5e-2, rtol=5e-2), \
        "bf16 kernel mismatch"

    print("KERNEL_OK")
</pallas_src>

<mosaic_0001>
module attributes {stable_mosaic.version = 11 : i64} {
  func.func @deepfm_kernel_split(%arg0: i32, %arg1: memref<128x64xf32, #tpu.memory_space<vmem>>, %arg2: memref<128x8xf32, #tpu.memory_space<vmem>>, %arg3: memref<128x64xf32, #tpu.memory_space<vmem>>, %arg4: memref<64x8xf32, #tpu.memory_space<vmem>>, %arg5: memref<64x32xf32, #tpu.memory_space<vmem>>, %arg6: memref<1x32xf32, #tpu.memory_space<vmem>>, %arg7: memref<32x16xf32, #tpu.memory_space<vmem>>, %arg8: memref<1x16xf32, #tpu.memory_space<vmem>>, %arg9: memref<16x128xf32, #tpu.memory_space<vmem>>, %arg10: memref<8x128xf32, #tpu.memory_space<vmem>>, %arg11: memref<8x128xf32, #tpu.memory_space<vmem>>, %arg12: memref<1x128xf32, #tpu.memory_space<vmem>>, %arg13: memref<128x128xf32, #tpu.memory_space<vmem>>) attributes {dimension_semantics = [#tpu.dimension_semantics<parallel>], iteration_bounds = array<i64: 1>, scalar_prefetch = 0 : i64, scratch_operands = 0 : i64, tpu.core_type = #tpu.core_type<tc>, window_params = [{transform_indices = @transform_0, window_bounds = array<i64: 128, 64>}, {transform_indices = @transform_1, window_bounds = array<i64: 128, 8>}, {transform_indices = @transform_2, window_bounds = array<i64: 128, 64>}, {pipeline_mode = #tpu.pipeline_mode<synchronous>, transform_indices = @transform_3, window_bounds = array<i64: 64, 8>}, {pipeline_mode = #tpu.pipeline_mode<synchronous>, transform_indices = @transform_4, window_bounds = array<i64: 64, 32>}, {pipeline_mode = #tpu.pipeline_mode<synchronous>, transform_indices = @transform_5, window_bounds = array<i64: 1, 32>}, {pipeline_mode = #tpu.pipeline_mode<synchronous>, transform_indices = @transform_6, window_bounds = array<i64: 32, 16>}, {pipeline_mode = #tpu.pipeline_mode<synchronous>, transform_indices = @transform_7, window_bounds = array<i64: 1, 16>}, {pipeline_mode = #tpu.pipeline_mode<synchronous>, transform_indices = @transform_8, window_bounds = array<i64: 16, 128>}, {pipeline_mode = #tpu.pipeline_mode<synchronous>, transform_indices = @transform_9, window_bounds = array<i64: 8, 128>}, {pipeline_mode = #tpu.pipeline_mode<synchronous>, transform_indices = @transform_10, window_bounds = array<i64: 8, 128>}, {pipeline_mode = #tpu.pipeline_mode<synchronous>, transform_indices = @transform_11, window_bounds = array<i64: 1, 128>}, {transform_indices = @transform_12, window_bounds = array<i64: 128, 128>}]} {
    %c0 = arith.constant 0 : index
    %c0_0 = arith.constant 0 : index
    %0 = vector.load %arg1[%c0, %c0_0] : memref<128x64xf32, #tpu.memory_space<vmem>>, vector<128x64xf32>
    %c0_1 = arith.constant 0 : index
    %c0_2 = arith.constant 0 : index
    %1 = vector.load %arg2[%c0_1, %c0_2] : memref<128x8xf32, #tpu.memory_space<vmem>>, vector<128x8xf32>
    %c0_3 = arith.constant 0 : index
    %c0_4 = arith.constant 0 : index
    %2 = vector.load %arg3[%c0_3, %c0_4] : memref<128x64xf32, #tpu.memory_space<vmem>>, vector<128x64xf32>
    %c0_5 = arith.constant 0 : index
    %c0_6 = arith.constant 0 : index
    %3 = vector.load %arg4[%c0_5, %c0_6] : memref<64x8xf32, #tpu.memory_space<vmem>>, vector<64x8xf32>
    %c0_7 = arith.constant 0 : index
    %c0_8 = arith.constant 0 : index
    %4 = vector.load %arg5[%c0_7, %c0_8] : memref<64x32xf32, #tpu.memory_space<vmem>>, vector<64x32xf32>
    %c0_9 = arith.constant 0 : index
    %c0_10 = arith.constant 0 : index
    %5 = vector.load %arg6[%c0_9, %c0_10] : memref<1x32xf32, #tpu.memory_space<vmem>>, vector<1x32xf32>
    %c0_11 = arith.constant 0 : index
    %c0_12 = arith.constant 0 : index
    %6 = vector.load %arg7[%c0_11, %c0_12] : memref<32x16xf32, #tpu.memory_space<vmem>>, vector<32x16xf32>
    %c0_13 = arith.constant 0 : index
    %c0_14 = arith.constant 0 : index
    %7 = vector.load %arg8[%c0_13, %c0_14] : memref<1x16xf32, #tpu.memory_space<vmem>>, vector<1x16xf32>
    %c0_15 = arith.constant 0 : index
    %c0_16 = arith.constant 0 : index
    %8 = vector.load %arg9[%c0_15, %c0_16] : memref<16x128xf32, #tpu.memory_space<vmem>>, vector<16x128xf32>
    %c0_17 = arith.constant 0 : index
    %c0_18 = arith.constant 0 : index
    %9 = vector.load %arg10[%c0_17, %c0_18] : memref<8x128xf32, #tpu.memory_space<vmem>>, vector<8x128xf32>
    %c0_19 = arith.constant 0 : index
    %c0_20 = arith.constant 0 : index
    %10 = vector.load %arg11[%c0_19, %c0_20] : memref<8x128xf32, #tpu.memory_space<vmem>>, vector<8x128xf32>
    %c0_21 = arith.constant 0 : index
    %c0_22 = arith.constant 0 : index
    %11 = vector.load %arg12[%c0_21, %c0_22] : memref<1x128xf32, #tpu.memory_space<vmem>>, vector<1x128xf32>
    %cst = arith.constant dense<0.000000e+00> : vector<128x8xf32>
    %12 = tpu.matmul %2, %3, %cst {dimension_numbers = #tpu.dot_dimension_numbers<[1], [0], [0], [1], [0, 0, 1, 1], [], []>} : vector<128x64xf32>, vector<64x8xf32>, vector<128x8xf32> -> vector<128x8xf32>
    %13 = arith.mulf %2, %2 : vector<128x64xf32>
    %cst_23 = arith.constant dense<0.000000e+00> : vector<128x8xf32>
    %14 = tpu.matmul %13, %3, %cst_23 {dimension_numbers = #tpu.dot_dimension_numbers<[1], [0], [0], [1], [0, 0, 1, 1], [], []>} : vector<128x64xf32>, vector<64x8xf32>, vector<128x8xf32> -> vector<128x8xf32>
    %15 = arith.mulf %12, %12 : vector<128x8xf32>
    %16 = arith.subf %15, %14 : vector<128x8xf32>
    %cst_24 = arith.constant 5.000000e-01 : f32
    %17 = vector.broadcast %cst_24 : f32 to vector<128x8xf32>
    %18 = arith.mulf %17, %16 : vector<128x8xf32>
    %cst_25 = arith.constant dense<0.000000e+00> : vector<128x32xf32>
    %19 = tpu.matmul %0, %4, %cst_25 {dimension_numbers = #tpu.dot_dimension_numbers<[1], [0], [0], [1], [0, 0, 1, 1], [], []>} : vector<128x64xf32>, vector<64x32xf32>, vector<128x32xf32> -> vector<128x32xf32>
    %20 = vector.broadcast %5 : vector<1x32xf32> to vector<128x32xf32>
    %21 = arith.addf %19, %20 : vector<128x32xf32>
    %cst_26 = arith.constant 0.000000e+00 : f32
    %22 = vector.broadcast %cst_26 : f32 to vector<128x32xf32>
    %23 = arith.maximumf %21, %22 : vector<128x32xf32>
    %cst_27 = arith.constant dense<0.000000e+00> : vector<128x16xf32>
    %24 = tpu.matmul %23, %6, %cst_27 {dimension_numbers = #tpu.dot_dimension_numbers<[1], [0], [0], [1], [0, 0, 1, 1], [], []>} : vector<128x32xf32>, vector<32x16xf32>, vector<128x16xf32> -> vector<128x16xf32>
    %25 = vector.broadcast %7 : vector<1x16xf32> to vector<128x16xf32>
    %26 = arith.addf %24, %25 : vector<128x16xf32>
    %cst_28 = arith.constant 0.000000e+00 : f32
    %27 = vector.broadcast %cst_28 : f32 to vector<128x16xf32>
    %28 = arith.maximumf %26, %27 : vector<128x16xf32>
    %cst_29 = arith.constant dense<0.000000e+00> : vector<128x128xf32>
    %29 = tpu.matmul %28, %8, %cst_29 {dimension_numbers = #tpu.dot_dimension_numbers<[1], [0], [0], [1], [0, 0, 1, 1], [], []>} : vector<128x16xf32>, vector<16x128xf32>, vector<128x128xf32> -> vector<128x128xf32>
    %cst_30 = arith.constant dense<0.000000e+00> : vector<128x128xf32>
    %30 = tpu.matmul %1, %9, %cst_30 {dimension_numbers = #tpu.dot_dimension_numbers<[1], [0], [0], [1], [0, 0, 1, 1], [], []>} : vector<128x8xf32>, vector<8x128xf32>, vector<128x128xf32> -> vector<128x128xf32>
    %31 = arith.addf %29, %30 : vector<128x128xf32>
    %cst_31 = arith.constant dense<0.000000e+00> : vector<128x128xf32>
    %32 = tpu.matmul %18, %10, %cst_31 {dimension_numbers = #tpu.dot_dimension_numbers<[1], [0], [0], [1], [0, 0, 1, 1], [], []>} : vector<128x8xf32>, vector<8x128xf32>, vector<128x128xf32> -> vector<128x128xf32>
    %33 = arith.addf %31, %32 : vector<128x128xf32>
    %34 = vector.broadcast %11 : vector<1x128xf32> to vector<128x128xf32>
    %35 = arith.addf %33, %34 : vector<128x128xf32>
    %36 = arith.negf %35 : vector<128x128xf32>
    %37 = math.exp %36 : vector<128x128xf32>
    %cst_32 = arith.constant 1.000000e+00 : f32
    %38 = vector.broadcast %cst_32 : f32 to vector<128x128xf32>
    %39 = arith.addf %38, %37 : vector<128x128xf32>
    %40 = arith.divf %38, %39 : vector<128x128xf32>
    %c0_33 = arith.constant 0 : index
    %c0_34 = arith.constant 0 : index
    %41 = vector.load %arg13[%c0_33, %c0_34] : memref<128x128xf32, #tpu.memory_space<vmem>>, vector<128x128xf32>
    tpu.vector_store %arg13[%c0_33, %c0_34], %40 {strides = array<i32>} : memref<128x128xf32, #tpu.memory_space<vmem>>, vector<128x128xf32>,
    return
  }
  func.func @transform_0(%arg0: i32) -> (i32, i32) {
    %c0_i32 = arith.constant 0 : i32
    %c0_i32_0 = arith.constant 0 : i32
    return %arg0, %c0_i32 : i32, i32
  }
  func.func @transform_1(%arg0: i32) -> (i32, i32) {
    %c0_i32 = arith.constant 0 : i32
    %c0_i32_0 = arith.constant 0 : i32
    return %arg0, %c0_i32 : i32, i32
  }
  func.func @transform_2(%arg0: i32) -> (i32, i32) {
    %c0_i32 = arith.constant 0 : i32
    %c0_i32_0 = arith.constant 0 : i32
    return %arg0, %c0_i32 : i32, i32
  }
  func.func @transform_3(%arg0: i32) -> (i32, i32) {
    %c0_i32 = arith.constant 0 : i32
    %c0_i32_0 = arith.constant 0 : i32
    %c0_i32_1 = arith.constant 0 : i32
    return %c0_i32, %c0_i32_0 : i32, i32
  }
  func.func @transform_4(%arg0: i32) -> (i32, i32) {
    %c0_i32 = arith.constant 0 : i32
    %c0_i32_0 = arith.constant 0 : i32
    %c0_i32_1 = arith.constant 0 : i32
    return %c0_i32, %c0_i32_0 : i32, i32
  }
  func.func @transform_5(%arg0: i32) -> (i32, i32) {
    %c0_i32 = arith.constant 0 : i32
    %c0_i32_0 = arith.constant 0 : i32
    %c0_i32_1 = arith.constant 0 : i32
    return %c0_i32, %c0_i32_0 : i32, i32
  }
  func.func @transform_6(%arg0: i32) -> (i32, i32) {
    %c0_i32 = arith.constant 0 : i32
    %c0_i32_0 = arith.constant 0 : i32
    %c0_i32_1 = arith.constant 0 : i32
    return %c0_i32, %c0_i32_0 : i32, i32
  }
  func.func @transform_7(%arg0: i32) -> (i32, i32) {
    %c0_i32 = arith.constant 0 : i32
    %c0_i32_0 = arith.constant 0 : i32
    %c0_i32_1 = arith.constant 0 : i32
    return %c0_i32, %c0_i32_0 : i32, i32
  }
  func.func @transform_8(%arg0: i32) -> (i32, i32) {
    %c0_i32 = arith.constant 0 : i32
    %c0_i32_0 = arith.constant 0 : i32
    %c0_i32_1 = arith.constant 0 : i32
    return %c0_i32, %c0_i32_0 : i32, i32
  }
  func.func @transform_9(%arg0: i32) -> (i32, i32) {
    %c0_i32 = arith.constant 0 : i32
    %c0_i32_0 = arith.constant 0 : i32
    %c0_i32_1 = arith.constant 0 : i32
    return %c0_i32, %c0_i32_0 : i32, i32
  }
  func.func @transform_10(%arg0: i32) -> (i32, i32) {
    %c0_i32 = arith.constant 0 : i32
    %c0_i32_0 = arith.constant 0 : i32
    %c0_i32_1 = arith.constant 0 : i32
    return %c0_i32, %c0_i32_0 : i32, i32
  }
  func.func @transform_11(%arg0: i32) -> (i32, i32) {
    %c0_i32 = arith.constant 0 : i32
    %c0_i32_0 = arith.constant 0 : i32
    %c0_i32_1 = arith.constant 0 : i32
    return %c0_i32, %c0_i32_0 : i32, i32
  }
  func.func @transform_12(%arg0: i32) -> (i32, i32) {
    %c0_i32 = arith.constant 0 : i32
    %c0_i32_0 = arith.constant 0 : i32
    return %arg0, %c0_i32 : i32, i32
  }
}

</mosaic_0001>

<bundles_post_ra>
// kernel: tpu_custom_call.1
= control target key start
LH: loop header
LB: loop body
LE: loop exit
PB: predicated region body
PF: predicated region fallthrough
CT: control target
= control target key end

     0   :  { %vm117_vm0 = vcmask 523264   ;;  %s2969_s0 = inlined_call_operand.vmem [shape: f32[128,64], index: 0, kind: input, shape index: {}]   ;;  %s2970_s1 = inlined_call_operand.vmem [shape: f32[128,8], index: 1, kind: input, shape index: {}]   ;;  %s2971_s2 = inlined_call_operand.vmem [shape: f32[128,64], index: 2, kind: input, shape index: {}]   ;;  %s2972_s3 = inlined_call_operand.vmem [shape: f32[64,8], index: 3, kind: input, shape index: {}]   ;;  %s2973_s4 = inlined_call_operand.vmem [shape: f32[64,32], index: 4, kind: input, shape index: {}]   ;;  %s2974_s5 = inlined_call_operand.vmem [shape: f32[1,32], index: 5, kind: input, shape index: {}]   ;;  %s2975_s6 = inlined_call_operand.vmem [shape: f32[32,16], index: 6, kind: input, shape index: {}]   ;;  %s2976_s7 = inlined_call_operand.vmem [shape: f32[1,16], index: 7, kind: input, shape index: {}]   ;;  %s2977_s8 = inlined_call_operand.vmem [shape: f32[16,128], index: 8, kind: input, shape index: {}]   ;;  %s2978_s9 = inlined_call_operand.vmem [shape: f32[8,128], index: 9, kind: input, shape index: {}]   ;;  %s2979_s10 = inlined_call_operand.vmem [shape: f32[8,128], index: 10, kind: input, shape index: {}]   ;;  %s2980_s11 = inlined_call_operand.vmem [shape: f32[1,128], index: 11, kind: input, shape index: {}]   ;;  %s2981_s12 = inlined_call_operand.hbm [shape: f32[128,128], index: 12, kind: output, shape index: {}]  }
   0x1   :  { %v97_v0 = vld [vmem:[%s2972_s3 + $0x38] sm:$0xff]  ;;  %v2432_v1 = vld [vmem:[%s2972_s3 + $0x30] sm:$0xff]  ;;  %v2437_v2 = vld [vmem:[%s2972_s3 + $0x28] sm:$0xff] }
   0x2   :  { %2021 = vmatprep.subr.mxu0 %v97_v0  ;;  %2253 = vmatprep.subr.mxu1 %v97_v0  ;;  %v2446_v3 = vld [vmem:[%s2972_s3 + $0x20] sm:$0xff]  ;;  %v2455_v4 = vld [vmem:[%s2972_s3 + $0x18] sm:$0xff]  ;;  %v2464_v5 = vld [vmem:[%s2972_s3 + $0x10] sm:$0xff] }
   0x3   :  { %2022 = vmatpush3.msra.mxu0 %v97_v0  ;;  %2261 = vmatpush3.msra.mxu1 %v97_v0  ;;  %v2473_v6 = vld [vmem:[%s2972_s3 + $0x8] sm:$0xff]  ;;  %v2482_v7 = vld [vmem:[%s2972_s3] sm:$0xff]  ;;  %v105_v12 = vld [vmem:[%s2973_s4 + $0x38] sm:$0xff] }
   0x4   :  { %2023 = vmatprep.subr.mxu0 %v2432_v1  ;;  %2254 = vmatprep.subr.mxu1 %v2432_v1  ;;  %v2491_v8 = vld [vmem:[%s2971_s2] sm:$0xff]  ;;  %v2503_v10 = vld [vmem:[%s2971_s2 + $0x8] sm:$0xff]  ;;  %v104_v13 = vld [vmem:[%s2973_s4 + $0x30] sm:$0xff] }
   0x5   :  { %2024 = vmatpush3.msra.mxu0 %v2432_v1  ;;  %2262 = vmatpush3.msra.mxu1 %v2432_v1  ;;  %v2496_v9 = vld [vmem:[%s2971_s2 + $0x40] sm:$0xff]  ;;  %v2508_v11 = vld [vmem:[%s2971_s2 + $0x48] sm:$0xff] }
   0x6   :  { %2025 = vmatprep.subr.mxu0 %v2437_v2  ;;  %2255 = vmatprep.subr.mxu1 %v2437_v2 }
   0x7   :  { %2026 = vmatpush3.msra.mxu0 %v2437_v2  ;;  %2263 = vmatpush3.msra.mxu1 %v2437_v2 }
   0x8   :  { %2027 = vmatprep.subr.mxu0 %v2446_v3  ;;  %2256 = vmatprep.subr.mxu1 %v2446_v3 }
   0x9   :  { %2028 = vmatpush3.msra.mxu0 %v2446_v3  ;;  %2264 = vmatpush3.msra.mxu1 %v2446_v3 }
   0xa   :  { %2029 = vmatprep.subr.mxu0 %v2455_v4  ;;  %2257 = vmatprep.subr.mxu1 %v2455_v4 }
   0xb   :  { %2030 = vmatpush3.msra.mxu0 %v2455_v4  ;;  %2265 = vmatpush3.msra.mxu1 %v2455_v4 }
   0xc   :  { %2031 = vmatprep.subr.mxu0 %v2464_v5  ;;  %2258 = vmatprep.subr.mxu1 %v2464_v5 }
   0xd   :  { %2032 = vmatpush3.msra.mxu0 %v2464_v5  ;;  %2266 = vmatpush3.msra.mxu1 %v2464_v5 }
   0xe   :  { %2033 = vmatprep.subr.mxu0 %v2473_v6  ;;  %2259 = vmatprep.subr.mxu1 %v2473_v6 }
   0xf   :  { %2034 = vmatpush3.msra.mxu0 %v2473_v6  ;;  %2267 = vmatpush3.msra.mxu1 %v2473_v6 }
  0x10   :  { %2035 = vmatprep.subr.mxu0 %v2482_v7  ;;  %2260 = vmatprep.subr.mxu1 %v2482_v7 }
  0x11   :  { %2036 = vmatpush3.msra.mxu0 %v2482_v7  ;;  %2268 = vmatpush3.msra.mxu1 %v2482_v7 }
  0x12   :  { %2037 = vmatprep.mubr.msk.f32.mxu0 %vm117_vm0, %v2491_v8  ;;  %2049 = vmatprep.mubr.msk.f32.mxu1 %vm117_vm0, %v2496_v9 }
  0x13   :  { %2038 = vmatmul.mubr.msk.f32.vlgmr.msra.gmra.mxu0 %vm117_vm0, %v2503_v10  ;;  %2050 = vmatmul.mubr.msk.f32.vlgmr.msra.gmra.mxu1 %vm117_vm0, %v2508_v11 }
  0x14   :  { %17 = vsyncpa [#allocation3], 0  ;;  %2061 = vmatprep.subr.mxu1 %v97_v0  ;;  %2101 = vmatprep.subr.mxu0 %v105_v12  ;;  %v76_v14 = vld [vmem:[%s2971_s2 + $0x10] sm:$0xff]  ;;  %v2538_v16 = vld [vmem:[%s2971_s2 + $0x18] sm:$0xff]  ;;  %v311_v31 = vmul.f32 %v2491_v8, %v2491_v8  ;;  %v312_v33 = vmul.f32 %v2503_v10, %v2503_v10  ;;  %v319_v49 = vmul.f32 %v2496_v9, %v2496_v9  ;;  %vm999_vm1 = vcmask 64512  }
  0x15   :  { %v2532_v15 = vld [vmem:[%s2971_s2 + $0x50] sm:$0xff]  ;;  %2062 = vmatpush3.msra.mxu1 %v97_v0  ;;  %2102 = vmatpush3.msra.mxu0 %v105_v12  ;;  %v2543_v17 = vld [vmem:[%s2971_s2 + $0x58] sm:$0xff]  ;;  %v103_v18 = vld [vmem:[%s2973_s4 + $0x28] sm:$0xff]  ;;  %v313_v35 = vmul.f32 %v76_v14, %v76_v14  ;;  %v314_v40 = vmul.f32 %v2538_v16, %v2538_v16  ;;  %v320_v52 = vmul.f32 %v2508_v11, %v2508_v11  ;;  %vm789_vm2 = vcmask 261120  }
  0x16   :  { %2063 = vmatprep.subr.mxu1 %v2432_v1  ;;  %2103 = vmatprep.subr.mxu0 %v104_v13  ;;  %v102_v19 = vld [vmem:[%s2973_s4 + $0x20] sm:$0xff]  ;;  %v79_v22 = vld [vmem:[%s2971_s2 + $0x28] sm:$0xff]  ;;  %v101_v24 = vld [vmem:[%s2973_s4 + $0x18] sm:$0xff]  ;;  %v321_v53 = vmul.f32 %v2532_v15, %v2532_v15  ;;  %v322_v56 = vmul.f32 %v2543_v17, %v2543_v17  ;;  %vm1193_vm3 = vcmask 130048  }
  0x17   :  { %2040 = vmatprep.mubr.msk.f32.mxu0 %vm117_vm0, %v76_v14  ;;  %2052 = vmatprep.mubr.msk.f32.mxu1 %vm117_vm0, %v2532_v15  ;;  %v78_v20 = vld [vmem:[%s2971_s2 + $0x20] sm:$0xff]  ;;  %v2576_v23 = vld [vmem:[%s2971_s2 + $0x68] sm:$0xff]  ;;  %v100_v25 = vld [vmem:[%s2973_s4 + $0x10] sm:$0xff]  ;;  %v316_v44 = vmul.f32 %v79_v22, %v79_v22 }
  0x18   :  { %2064 = vmatpush3.msra.mxu1 %v2432_v1  ;;  %2104 = vmatpush3.msra.mxu0 %v104_v13  ;;  %v2566_v21 = vld [vmem:[%s2971_s2 + $0x60] sm:$0xff]  ;;  %v80_v26 = vld [vmem:[%s2971_s2 + $0x30] sm:$0xff]  ;;  %v81_v28 = vld [vmem:[%s2971_s2 + $0x38] sm:$0xff]  ;;  %v315_v41 = vmul.f32 %v78_v20, %v78_v20  ;;  %v324_v60 = vmul.f32 %v2576_v23, %v2576_v23 }
  0x19   :  { %2041 = vmatmul.mubr.msk.f32.gmra.mxu0 %vm117_vm0, %v2538_v16  ;;  %2053 = vmatmul.mubr.msk.f32.gmra.mxu1 %vm117_vm0, %v2543_v17  ;;  %v2598_v27 = vld [vmem:[%s2971_s2 + $0x70] sm:$0xff]  ;;  %v2608_v29 = vld [vmem:[%s2971_s2 + $0x78] sm:$0xff]  ;;  %v99_v30 = vld [vmem:[%s2973_s4 + $0x8] sm:$0xff]  ;;  %v317_v45 = vmul.f32 %v80_v26, %v80_v26  ;;  %v318_v48 = vmul.f32 %v81_v28, %v81_v28  ;;  %v323_v57 = vmul.f32 %v2566_v21, %v2566_v21 }
  0x1a   :  { %2065 = vmatprep.subr.mxu1 %v2437_v2  ;;  %2105 = vmatprep.subr.mxu0 %v103_v18  ;;  %v98_v32 = vld [vmem:[%s2973_s4] sm:$0xff]  ;;  %v43_v36 = vld [vmem:[%s2969_s0 + $0x8] sm:$0xff]  ;;  %v44_v37 = vld [vmem:[%s2969_s0 + $0x10] sm:$0xff]  ;;  %v325_v61 = vmul.f32 %v2598_v27, %v2598_v27  ;;  %v326_v0 = vmul.f32 %v2608_v29, %v2608_v29 }
  0x1b   :  { %2066 = vmatpush3.msra.mxu1 %v2437_v2  ;;  %2106 = vmatpush3.msra.mxu0 %v103_v18  ;;  %v42_v34 = vld [vmem:[%s2969_s0] sm:$0xff]  ;;  %v110_v39 = vld [vmem:[%s2975_s6 + $0x18] sm:$0xff]  ;;  %v47_v46 = vld [vmem:[%s2969_s0 + $0x28] sm:$0xff] }
  0x1c   :  { %2067 = vmatprep.subr.mxu1 %v2446_v3  ;;  %2107 = vmatprep.subr.mxu0 %v102_v19  ;;  %v114_v38 = vld [vmem:[%s2978_s9] sm:$0xff]  ;;  %v45_v42 = vld [vmem:[%s2969_s0 + $0x18] sm:$0xff]  ;;  %v48_v47 = vld [vmem:[%s2969_s0 + $0x30] sm:$0xff] }
  0x1d   :  { %2043 = vmatprep.mubr.msk.f32.mxu0 %vm117_vm0, %v78_v20  ;;  %2055 = vmatprep.mubr.msk.f32.mxu1 %vm117_vm0, %v2566_v21  ;;  %v46_v43 = vld [vmem:[%s2969_s0 + $0x20] sm:$0xff]  ;;  %v49_v50 = vld [vmem:[%s2969_s0 + $0x38] sm:$0xff]  ;;  %v51_v54 = vld [vmem:[%s2969_s0 + $0x48] sm:$0xff] }
  0x1e   :  { %2068 = vmatpush3.msra.mxu1 %v2446_v3  ;;  %2108 = vmatpush3.msra.mxu0 %v102_v19  ;;  %v50_v51 = vld [vmem:[%s2969_s0 + $0x40] sm:$0xff]  ;;  %v52_v55 = vld [vmem:[%s2969_s0 + $0x50] sm:$0xff]  ;;  %v53_v58 = vld [vmem:[%s2969_s0 + $0x58] sm:$0xff] }
  0x1f   :  { %2044 = vmatmul.mubr.msk.f32.gmra.mxu0 %vm117_vm0, %v79_v22  ;;  %2056 = vmatmul.mubr.msk.f32.gmra.mxu1 %vm117_vm0, %v2576_v23  ;;  %v54_v59 = vld [vmem:[%s2969_s0 + $0x60] sm:$0xff]  ;;  %v55_v62 = vld [vmem:[%s2969_s0 + $0x68] sm:$0xff]  ;;  %v56_v63 = vld [vmem:[%s2969_s0 + $0x70] sm:$0xff] }
  0x20   :  { %2069 = vmatprep.subr.mxu1 %v2455_v4  ;;  %2109 = vmatprep.subr.mxu0 %v101_v24  ;;  %v57_v1 = vld [vmem:[%s2969_s0 + $0x78] sm:$0xff]  ;;  %v58_v2 = vld [vmem:[%s2970_s1] sm:$0xff]  ;;  %v59_v3 = vld [vmem:[%s2970_s1 + $0x8] sm:$0xff] }
  0x21   :  { %2070 = vmatpush3.msra.mxu1 %v2455_v4  ;;  %2110 = vmatpush3.msra.mxu0 %v101_v24  ;;  %v60_v4 = vld [vmem:[%s2970_s1 + $0x10] sm:$0xff]  ;;  %v63_v8 = vld [vmem:[%s2970_s1 + $0x28] sm:$0xff]  ;;  %v65_v10 = vld [vmem:[%s2970_s1 + $0x38] sm:$0xff] }
  0x22   :  { %2071 = vmatprep.subr.mxu1 %v2464_v5  ;;  %2111 = vmatprep.subr.mxu0 %v100_v25  ;;  %v64_v9 = vld [vmem:[%s2970_s1 + $0x30] sm:$0xff]  ;;  %v66_v11 = vld [vmem:[%s2970_s1 + $0x40] sm:$0xff]  ;;  %v108_v12 = vld [vmem:[%s2975_s6 + $0x8] sm:$0xff] }
  0x23   :  { %2046 = vmatprep.mubr.msk.f32.mxu0 %vm117_vm0, %v80_v26  ;;  %2058 = vmatprep.mubr.msk.f32.mxu1 %vm117_vm0, %v2598_v27  ;;  %v67_v13 = vld [vmem:[%s2970_s1 + $0x48] sm:$0xff]  ;;  %v68_v14 = vld [vmem:[%s2970_s1 + $0x50] sm:$0xff]  ;;  %v69_v15 = vld [vmem:[%s2970_s1 + $0x58] sm:$0xff] }
  0x24   :  { %2072 = vmatpush3.msra.mxu1 %v2464_v5  ;;  %2112 = vmatpush3.msra.mxu0 %v100_v25  ;;  %v61_v5 = vld [vmem:[%s2970_s1 + $0x18] sm:$0xff]  ;;  %v70_v16 = vld [vmem:[%s2970_s1 + $0x60] sm:$0xff]  ;;  %v71_v17 = vld [vmem:[%s2970_s1 + $0x68] sm:$0xff] }
  0x25   :  { %2047 = vmatmul.mubr.msk.f32.gmra.mxu0 %vm117_vm0, %v81_v28  ;;  %2059 = vmatmul.mubr.msk.f32.gmra.mxu1 %vm117_vm0, %v2608_v29  ;;  %v72_v18 = vld [vmem:[%s2970_s1 + $0x70] sm:$0xff]  ;;  %v107_v19 = vld [vmem:[%s2975_s6] sm:$0xff]  ;;  %v73_v20 = vld [vmem:[%s2970_s1 + $0x78] sm:$0xff] }
  0x26   :  { %2073 = vmatprep.subr.mxu1 %v2473_v6  ;;  %2113 = vmatprep.subr.mxu0 %v99_v30  ;;  %v115_v21 = vld [vmem:[%s2979_s10] sm:$0xff]  ;;  %v113_v22 = vld [vmem:[%s2977_s8 + $0x8] sm:$0xff] }
  0x27   :  { %2074 = vmatpush3.msra.mxu1 %v2473_v6  ;;  %2114 = vmatpush3.msra.mxu0 %v99_v30  ;;  %v62_v6 = vld [vmem:[%s2970_s1 + $0x20] sm:$0xff] }
  0x28   :  { %2075 = vmatprep.subr.mxu1 %v2482_v7  ;;  %2115 = vmatprep.subr.mxu0 %v98_v32 }
  0x29   :  { %2076 = vmatpush3.msra.mxu1 %v2482_v7  ;;  %2077 = vmatprep.mubr.msk.f32.mxu1 %vm117_vm0, %v311_v31  ;;  %v109_v7 = vld [vmem:[%s2975_s6 + $0x10] sm:$0xff] }
  0x2a   :  { %2116 = vmatpush3.msra.mxu0 %v98_v32  ;;  %2117 = vmatprep.mubr.msk.f32.mxu0 %vm117_vm0, %v42_v34 }
  0x2b   :  { %2078 = vmatmul.mubr.msk.f32.vlgmr.msra.gmra.mxu1 %vm117_vm0, %v312_v33  ;;  %2118 = vmatmul.mubr.msk.f32.vlgmr.msra.gmra.mxu0 %vm117_vm0, %v43_v36 }
  0x2c   :  { %2080 = vmatprep.mubr.msk.f32.mxu1 %vm117_vm0, %v313_v35  ;;  %2120 = vmatprep.mubr.msk.f32.mxu0 %vm117_vm0, %v44_v37 }
  0x2d   :  { %2173 = vmatprep.subr.mxu0 %v114_v38  ;;  %2141 = vmatprep.subr.mxu1 %v110_v39 }
  0x2e   :  { %2174 = vmatpush3.msra.mxu0 %v114_v38  ;;  %2142 = vmatpush3.msra.mxu1 %v110_v39  ;;  %v2833_v39 = vld [vmem:[%s2974_s5] ss:$0 sm:$0xff] }
  0x2f   :  { %2081 = vmatmul.mubr.msk.f32.gmra.mxu1 %vm117_vm0, %v314_v40  ;;  %2121 = vmatmul.mubr.msk.f32.gmra.mxu0 %vm117_vm0, %v45_v42 }
  0x30   :  { %2083 = vmatprep.mubr.msk.f32.mxu1 %vm117_vm0, %v315_v41  ;;  %2123 = vmatprep.mubr.msk.f32.mxu0 %vm117_vm0, %v46_v43 }
  0x31   :  { %2143 = vmatprep.subr.mxu1 %v109_v7  ;;  %2227 = vmatprep.subr.mxu0 %v115_v21 }
  0x32   :  { %2144 = vmatpush3.msra.mxu1 %v109_v7 }
  0x33   :  { %2084 = vmatmul.mubr.msk.f32.gmra.mxu1 %vm117_vm0, %v316_v44  ;;  %2124 = vmatmul.mubr.msk.f32.gmra.mxu0 %vm117_vm0, %v47_v46 }
  0x34   :  { %2086 = vmatprep.mubr.msk.f32.mxu1 %vm117_vm0, %v317_v45  ;;  %2126 = vmatprep.mubr.msk.f32.mxu0 %vm117_vm0, %v48_v47 }
  0x35   :  { %2145 = vmatprep.subr.mxu1 %v108_v12 }
  0x36   :  { %2146 = vmatpush3.msra.mxu1 %v108_v12 }
  0x37   :  { %2087 = vmatmul.mubr.msk.f32.gmra.mxu1 %vm117_vm0, %v318_v48  ;;  %2127 = vmatmul.mubr.msk.f32.gmra.mxu0 %vm117_vm0, %v49_v50 }
  0x38   :  { %2129 = vmatprep.mubr.msk.f32.mxu0 %vm117_vm0, %v50_v51  ;;  %2089 = vmatprep.mubr.msk.f32.mxu1 %vm117_vm0, %v319_v49 }
  0x39   :  { %2147 = vmatprep.subr.mxu1 %v107_v19 }
  0x3a   :  { %2148 = vmatpush3.msra.mxu1 %v107_v19 }
  0x3b   :  { %2130 = vmatmul.mubr.msk.f32.gmra.mxu0 %vm117_vm0, %v51_v54  ;;  %2090 = vmatmul.mubr.msk.f32.gmra.mxu1 %vm117_vm0, %v320_v52 }
  0x3c   :  { %2132 = vmatprep.mubr.msk.f32.mxu0 %vm117_vm0, %v52_v55  ;;  %2092 = vmatprep.mubr.msk.f32.mxu1 %vm117_vm0, %v321_v53 }
  0x3d   :  { %2199 = vmatprep.subr.mxu1 %v113_v22 }
  0x3f   :  { %2133 = vmatmul.mubr.msk.f32.gmra.mxu0 %vm117_vm0, %v53_v58  ;;  %2093 = vmatmul.mubr.msk.f32.gmra.mxu1 %vm117_vm0, %v322_v56 }
  0x40   :  { %2135 = vmatprep.mubr.msk.f32.mxu0 %vm117_vm0, %v54_v59  ;;  %2095 = vmatprep.mubr.msk.f32.mxu1 %vm117_vm0, %v323_v57 }
  0x43   :  { %2136 = vmatmul.mubr.msk.f32.gmra.mxu0 %vm117_vm0, %v55_v62  ;;  %2096 = vmatmul.mubr.msk.f32.gmra.mxu1 %vm117_vm0, %v324_v60 }
  0x44   :  { %2138 = vmatprep.mubr.msk.f32.mxu0 %vm117_vm0, %v56_v63  ;;  %2098 = vmatprep.mubr.msk.f32.mxu1 %vm117_vm0, %v325_v61 }
  0x47   :  { %2139 = vmatmul.mubr.msk.f32.gmra.mxu0 %vm117_vm0, %v57_v1  ;;  %2099 = vmatmul.mubr.msk.f32.gmra.mxu1 %vm117_vm0, %v326_v0  ;;  %v112_v0 = vld [vmem:[%s2977_s8] sm:$0xff] }
  0x48   :  { %2175 = vmatprep.mubr.msk.f32.mxu0 %vm999_vm1, %v58_v2 }
  0x4b   :  { %2176 = vmatmul.mubr.msk.f32.vlgmr.msra.gmra.mxu0 %vm999_vm1, %v59_v3 }
  0x4c   :  { %2178 = vmatprep.mubr.msk.f32.mxu0 %vm999_vm1, %v60_v4  ;;  %2228 = vmatpush3.msra.mxu0 %v115_v21 }
  0x4f   :  { %2179 = vmatmul.mubr.msk.f32.gmra.mxu0 %vm999_vm1, %v61_v5 }
  0x50   :  { %2181 = vmatprep.mubr.msk.f32.mxu0 %vm999_vm1, %v62_v6 }
  0x53   :  { %2182 = vmatmul.mubr.msk.f32.gmra.mxu0 %vm999_vm1, %v63_v8 }
  0x54   :  { %2184 = vmatprep.mubr.msk.f32.mxu0 %vm999_vm1, %v64_v9 }
  0x57   :  { %2185 = vmatmul.mubr.msk.f32.gmra.mxu0 %vm999_vm1, %v65_v10 }
  0x58   :  { %2187 = vmatprep.mubr.msk.f32.mxu0 %vm999_vm1, %v66_v11 }
  0x5b   :  { %2188 = vmatmul.mubr.msk.f32.gmra.mxu0 %vm999_vm1, %v67_v13 }
  0x5c   :  { %2190 = vmatprep.mubr.msk.f32.mxu0 %vm999_vm1, %v68_v14 }
  0x5f   :  { %2191 = vmatmul.mubr.msk.f32.gmra.mxu0 %vm999_vm1, %v69_v15 }
  0x60   :  { %2193 = vmatprep.mubr.msk.f32.mxu0 %vm999_vm1, %v70_v16 }
  0x63   :  { %2194 = vmatmul.mubr.msk.f32.gmra.mxu0 %vm999_vm1, %v71_v17 }
  0x64   :  { %2196 = vmatprep.mubr.msk.f32.mxu0 %vm999_vm1, %v72_v18 }
  0x67   :  { %2197 = vmatmul.mubr.msk.f32.gmra.mxu0 %vm999_vm1, %v73_v20 }
  0xd3   :  { %v2039_v23 = vpop.f32.mrf.mxu0  ;;  %v2814_v24 = vpop.f32.mrf.mxu1 }
  0xd4   :  { %v521_v40 = vmul.f32 %v2039_v23, %v2039_v23  ;;  %v529_v18 = vmul.f32 %v2814_v24, %v2814_v24 }
  0xd5   :  { %v232_v25 = vpop.f32.mrf.mxu0  ;;  %v2816_v26 = vpop.f32.mrf.mxu1 }
  0xd6   :  { %v520_v43 = vmul.f32 %v232_v25, %v232_v25 }
  0xd9   :  { %v2042_v27 = vpop.f32.mrf.mxu0  ;;  %v2818_v28 = vpop.f32.mrf.mxu1 }
  0xda   :  { %v523_v50 = vmul.f32 %v2042_v27, %v2042_v27 }
  0xdb   :  { %v242_v29 = vpop.f32.mrf.mxu0  ;;  %v2820_v30 = vpop.f32.mrf.mxu1 }
  0xdc   :  { %v522_v53 = vmul.f32 %v242_v29, %v242_v29 }
  0xdf   :  { %v2045_v31 = vpop.f32.mrf.mxu0  ;;  %v2822_v32 = vpop.f32.mrf.mxu1 }
  0xe0   :  { %v525_v1 = vmul.f32 %v2045_v31, %v2045_v31 }
  0xe1   :  { %v252_v33 = vpop.f32.mrf.mxu0  ;;  %v2824_v34 = vpop.f32.mrf.mxu1 }
  0xe2   :  { %v524_v4 = vmul.f32 %v252_v33, %v252_v33  ;;  %v528_v33 = vmul.f32 %v2816_v26, %v2816_v26 }
  0xe5   :  { %v2048_v35 = vpop.f32.mrf.mxu0  ;;  %v2826_v36 = vpop.f32.mrf.mxu1 }
  0xe6   :  { %v527_v15 = vmul.f32 %v2048_v35, %v2048_v35 }
  0xe7   :  { %v262_v37 = vpop.f32.mrf.mxu0  ;;  %v2828_v38 = vpop.f32.mrf.mxu1 }
  0xe8   :  { %v526_v19 = vmul.f32 %v262_v37, %v262_v37 }
  0xeb   :  { %v2079_v41 = vpop.f32.mrf.mxu1  ;;  %v2119_v42 = vpop.f32.mrf.mxu0 }
  0xec   :  { %v537_v44 = vsub.f32 %v521_v40, %v2079_v41  ;;  %v694_v45 = vadd.f32 %v2119_v42, %v2833_v39  ;;  %v531_v41 = vmul.f32 %v2818_v28, %v2818_v28 }
  0xed   :  { %v441_v46 = vpop.f32.mrf.mxu1  ;;  %v688_v47 = vpop.f32.mrf.mxu0 }
  0xee   :  { %v536_v48 = vsub.f32 %v520_v43, %v441_v46  ;;  %v689_v49 = vadd.f32 %v2833_v39, %v688_v47  ;;  %v553_v56 = vmul.f32 0.5, %v537_v44  ;;  %v768_v57 = vmax.f32 %v694_v45, 0.0 }
  0xef   :  { %v2082_v51 = vpop.f32.mrf.mxu1  ;;  %v2122_v52 = vpop.f32.mrf.mxu0 }
  0xf0   :  { %v552_v54 = vmul.f32 0.5, %v536_v48  ;;  %v767_v55 = vmax.f32 %v689_v49, 0.0  ;;  %v539_v58 = vsub.f32 %v523_v50, %v2082_v51  ;;  %v704_v59 = vadd.f32 %v2122_v52, %v2833_v39 }
  0xf1   :  { %v451_v60 = vpop.f32.mrf.mxu1  ;;  %v698_v61 = vpop.f32.mrf.mxu0  ;;  %v530_v49 = vmul.f32 %v2820_v30, %v2820_v30 }
  0xf2   :  { %v538_v62 = vsub.f32 %v522_v53, %v451_v60  ;;  %v699_v63 = vadd.f32 %v2833_v39, %v698_v61  ;;  %2149 = vmatprep.mubr.msk.f32.mxu1 %vm789_vm2, %v767_v55  ;;  %2229 = vmatprep.mubr.msk.f32.mxu0 %vm999_vm1, %v552_v54  ;;  %v555_v7 = vmul.f32 0.5, %v539_v58  ;;  %v770_v8 = vmax.f32 %v704_v59, 0.0 }
  0xf3   :  { %v2085_v2 = vpop.f32.mrf.mxu1  ;;  %v2125_v3 = vpop.f32.mrf.mxu0  ;;  %2150 = vmatmul.mubr.msk.f32.vlgmr.msra.gmra.mxu1 %vm789_vm2, %v768_v57  ;;  %2230 = vmatmul.mubr.msk.f32.vlgmr.msra.gmra.mxu0 %vm999_vm1, %v553_v56  ;;  %v533_v54 = vmul.f32 %v2822_v32, %v2822_v32  ;;  %v532_v61 = vmul.f32 %v2824_v34, %v2824_v34 }
  0xf4   :  { %v554_v5 = vmul.f32 0.5, %v538_v62  ;;  %v769_v6 = vmax.f32 %v699_v63, 0.0  ;;  %2200 = vmatpush3.msra.mxu1 %v113_v22  ;;  %v541_v9 = vsub.f32 %v525_v1, %v2085_v2  ;;  %v714_v10 = vadd.f32 %v2125_v3, %v2833_v39 }
  0xf5   :  { %v461_v11 = vpop.f32.mrf.mxu1  ;;  %v708_v12 = vpop.f32.mrf.mxu0  ;;  %2201 = vmatprep.subr.mxu1 %v112_v0  ;;  %v535_v2 = vmul.f32 %v2826_v36, %v2826_v36 }
  0xf6   :  { %v540_v13 = vsub.f32 %v524_v4, %v461_v11  ;;  %v709_v14 = vadd.f32 %v2833_v39, %v708_v12  ;;  %2152 = vmatprep.mubr.msk.f32.mxu1 %vm789_vm2, %v769_v6  ;;  %2232 = vmatprep.mubr.msk.f32.mxu0 %vm999_vm1, %v554_v5  ;;  %v557_v22 = vmul.f32 0.5, %v541_v9  ;;  %v772_v23 = vmax.f32 %v714_v10, 0.0 }
  0xf7   :  { %v2088_v16 = vpop.f32.mrf.mxu1  ;;  %v2128_v17 = vpop.f32.mrf.mxu0  ;;  %2153 = vmatmul.mubr.msk.f32.gmra.mxu1 %vm789_vm2, %v770_v8  ;;  %2233 = vmatmul.mubr.msk.f32.gmra.mxu0 %vm999_vm1, %v555_v7  ;;  %v534_v9 = vmul.f32 %v2828_v38, %v2828_v38 }
  0xf8   :  { %v556_v20 = vmul.f32 0.5, %v540_v13  ;;  %v771_v21 = vmax.f32 %v709_v14, 0.0  ;;  %2202 = vmatpush3.msra.mxu1 %v112_v0  ;;  %v543_v25 = vsub.f32 %v527_v15, %v2088_v16  ;;  %v724_v27 = vadd.f32 %v2128_v17, %v2833_v39 }
  0xf9   :  { %v471_v29 = vpop.f32.mrf.mxu1  ;;  %v718_v31 = vpop.f32.mrf.mxu0 }
  0xfa   :  { %v542_v35 = vsub.f32 %v526_v19, %v471_v29  ;;  %v719_v40 = vadd.f32 %v2833_v39, %v718_v31  ;;  %2155 = vmatprep.mubr.msk.f32.mxu1 %vm789_vm2, %v771_v21  ;;  %2235 = vmatprep.mubr.msk.f32.mxu0 %vm999_vm1, %v556_v20  ;;  %v559_v26 = vmul.f32 0.5, %v543_v25  ;;  %v774_v45 = vmax.f32 %v724_v27, 0.0 }
  0xfb   :  { %v2131_v24 = vpop.f32.mrf.mxu0  ;;  %2156 = vmatmul.mubr.msk.f32.gmra.mxu1 %vm789_vm2, %v772_v23  ;;  %2236 = vmatmul.mubr.msk.f32.gmra.mxu0 %vm999_vm1, %v557_v22  ;;  %v2091_v37 = vpop.f32.mrf.mxu1 }
  0xfc   :  { %v558_v42 = vmul.f32 0.5, %v542_v35  ;;  %v773_v43 = vmax.f32 %v719_v40, 0.0  ;;  %v545_v44 = vsub.f32 %v529_v18, %v2091_v37  ;;  %v734_v46 = vadd.f32 %v2131_v24, %v2833_v39 }
  0xfd   :  { %v728_v47 = vpop.f32.mrf.mxu0  ;;  %v481_v48 = vpop.f32.mrf.mxu1 }
  0xfe   :  { %v729_v50 = vadd.f32 %v2833_v39, %v728_v47  ;;  %2158 = vmatprep.mubr.msk.f32.mxu1 %vm789_vm2, %v773_v43  ;;  %2238 = vmatprep.mubr.msk.f32.mxu0 %vm999_vm1, %v558_v42  ;;  %v544_v51 = vsub.f32 %v528_v33, %v481_v48  ;;  %v561_v52 = vmul.f32 0.5, %v545_v44  ;;  %v776_v57 = vmax.f32 %v734_v46, 0.0 }
  0xff   :  { %v2134_v28 = vpop.f32.mrf.mxu0  ;;  %2159 = vmatmul.mubr.msk.f32.gmra.mxu1 %vm789_vm2, %v774_v45  ;;  %2239 = vmatmul.mubr.msk.f32.gmra.mxu0 %vm999_vm1, %v559_v26  ;;  %v2094_v53 = vpop.f32.mrf.mxu1 }
 0x100   :  { %v775_v55 = vmax.f32 %v729_v50, 0.0  ;;  %v560_v56 = vmul.f32 0.5, %v544_v51  ;;  %v547_v30 = vsub.f32 %v531_v41, %v2094_v53  ;;  %v744_v58 = vadd.f32 %v2134_v28, %v2833_v39 }
 0x101   :  { %v738_v59 = vpop.f32.mrf.mxu0  ;;  %v491_v60 = vpop.f32.mrf.mxu1 }
 0x102   :  { %v739_v62 = vadd.f32 %v2833_v39, %v738_v59  ;;  %2161 = vmatprep.mubr.msk.f32.mxu1 %vm789_vm2, %v775_v55  ;;  %v546_v63 = vsub.f32 %v530_v49, %v491_v60  ;;  %2241 = vmatprep.mubr.msk.f32.mxu0 %vm999_vm1, %v560_v56  ;;  %v563_v32 = vmul.f32 0.5, %v547_v30  ;;  %v778_v5 = vmax.f32 %v744_v58, 0.0 }
 0x103   :  { %v2137_v0 = vpop.f32.mrf.mxu0  ;;  %2162 = vmatmul.mubr.msk.f32.gmra.mxu1 %vm789_vm2, %v776_v57  ;;  %v2097_v1 = vpop.f32.mrf.mxu1  ;;  %2242 = vmatmul.mubr.msk.f32.gmra.mxu0 %vm999_vm1, %v561_v52 }
 0x104   :  { %v777_v3 = vmax.f32 %v739_v62, 0.0  ;;  %v562_v4 = vmul.f32 0.5, %v546_v63  ;;  %v549_v34 = vsub.f32 %v533_v54, %v2097_v1  ;;  %v754_v6 = vadd.f32 %v2137_v0, %v2833_v39 }
 0x105   :  { %v748_v7 = vpop.f32.mrf.mxu0  ;;  %v501_v8 = vpop.f32.mrf.mxu1 }
 0x106   :  { %v749_v10 = vadd.f32 %v2833_v39, %v748_v7  ;;  %2164 = vmatprep.mubr.msk.f32.mxu1 %vm789_vm2, %v777_v3  ;;  %v548_v11 = vsub.f32 %v532_v61, %v501_v8  ;;  %2244 = vmatprep.mubr.msk.f32.mxu0 %vm999_vm1, %v562_v4  ;;  %v565_v36 = vmul.f32 0.5, %v549_v34  ;;  %v780_v17 = vmax.f32 %v754_v6, 0.0 }
 0x107   :  { %v2140_v12 = vpop.f32.mrf.mxu0  ;;  %2165 = vmatmul.mubr.msk.f32.gmra.mxu1 %vm789_vm2, %v778_v5  ;;  %v2100_v13 = vpop.f32.mrf.mxu1  ;;  %2245 = vmatmul.mubr.msk.f32.gmra.mxu0 %vm999_vm1, %v563_v32 }
 0x108   :  { %v779_v14 = vmax.f32 %v749_v10, 0.0  ;;  %v564_v15 = vmul.f32 0.5, %v548_v11  ;;  %v551_v16 = vsub.f32 %v535_v2, %v2100_v13  ;;  %v764_v38 = vadd.f32 %v2140_v12, %v2833_v39 }
 0x109   :  { %v758_v18 = vpop.f32.mrf.mxu0  ;;  %v511_v19 = vpop.f32.mrf.mxu1 }
 0x10a   :  { %v759_v20 = vadd.f32 %v2833_v39, %v758_v18  ;;  %2167 = vmatprep.mubr.msk.f32.mxu1 %vm789_vm2, %v779_v14  ;;  %v550_v21 = vsub.f32 %v534_v9, %v511_v19  ;;  %2247 = vmatprep.mubr.msk.f32.mxu0 %vm999_vm1, %v564_v15  ;;  %v567_v22 = vmul.f32 0.5, %v551_v16  ;;  %v782_v27 = vmax.f32 %v764_v38, 0.0  ;;  %v1795_v39 = vld [vmem:[%s2976_s7] ss:$0 sm:$0xff] }
 0x10b   :  { %2168 = vmatmul.mubr.msk.f32.gmra.mxu1 %vm789_vm2, %v780_v17  ;;  %2248 = vmatmul.mubr.msk.f32.gmra.mxu0 %vm999_vm1, %v565_v36  ;;  %v2177_v36 = vpop.f32.mrf.mxu0 }
 0x10c   :  { %v781_v23 = vmax.f32 %v759_v20, 0.0  ;;  %v566_v25 = vmul.f32 0.5, %v550_v21 }
 0x10d   :  { %v1114_v13 = vpop.f32.mrf.mxu0 }
 0x10e   :  { %2170 = vmatprep.mubr.msk.f32.mxu1 %vm789_vm2, %v781_v23  ;;  %2250 = vmatprep.mubr.msk.f32.mxu0 %vm999_vm1, %v566_v25 }
 0x10f   :  { %2171 = vmatmul.mubr.msk.f32.gmra.mxu1 %vm789_vm2, %v782_v27  ;;  %2251 = vmatmul.mubr.msk.f32.gmra.mxu0 %vm999_vm1, %v567_v22  ;;  %v2180_v14 = vpop.f32.mrf.mxu0 }
 0x111   :  { %v1124_v15 = vpop.f32.mrf.mxu0 }
 0x113   :  { %v2183_v16 = vpop.f32.mrf.mxu0 }
 0x115   :  { %v1134_v17 = vpop.f32.mrf.mxu0 }
 0x117   :  { %v2186_v38 = vpop.f32.mrf.mxu0 }
 0x119   :  { %v1144_v18 = vpop.f32.mrf.mxu0 }
 0x11b   :  { %v2921_v19 = vpop.f32.mrf.mxu0 }
 0x11d   :  { %v2923_v20 = vpop.f32.mrf.mxu0 }
 0x11f   :  { %v2925_v21 = vpop.f32.mrf.mxu0 }
 0x121   :  { %v2927_v22 = vpop.f32.mrf.mxu0 }
 0x123   :  { %v2929_v23 = vpop.f32.mrf.mxu0 }
 0x125   :  { %v2931_v25 = vpop.f32.mrf.mxu0 }
 0x127   :  { %v2933_v27 = vpop.f32.mrf.mxu0 }
 0x1b3   :  { %v2151_v29 = vpop.f32.mrf.mxu1 }
 0x1b4   :  { %v910_v31 = vadd.f32 %v2151_v29, %v1795_v39 }
 0x1b5   :  { %v904_v33 = vpop.f32.mrf.mxu1 }
 0x1b6   :  { %v905_v35 = vadd.f32 %v1795_v39, %v904_v33  ;;  %v984_v37 = vmax.f32 %v910_v31, 0.0 }
 0x1b7   :  { %v2154_v40 = vpop.f32.mrf.mxu1 }
 0x1b8   :  { %v983_v24 = vmax.f32 %v905_v35, 0.0  ;;  %v920_v41 = vadd.f32 %v2154_v40, %v1795_v39 }
 0x1b9   :  { %v914_v42 = vpop.f32.mrf.mxu1 }
 0x1ba   :  { %v915_v43 = vadd.f32 %v1795_v39, %v914_v42  ;;  %2203 = vmatprep.mubr.msk.f32.mxu1 %vm1193_vm3, %v983_v24  ;;  %v986_v45 = vmax.f32 %v920_v41, 0.0 }
 0x1bb   :  { %v2157_v44 = vpop.f32.mrf.mxu1  ;;  %2204 = vmatmul.mubr.msk.f32.vlgmr.msra.gmra.mxu1 %vm1193_vm3, %v984_v37 }
 0x1bc   :  { %v985_v26 = vmax.f32 %v915_v43, 0.0  ;;  %v930_v46 = vadd.f32 %v2157_v44, %v1795_v39  ;;  %v2940_v44 = vld [vmem:[%s2980_s11] ss:$0 sm:$0xff]  ;;  %s2358_s11 = smov [#allocation2]  }
 0x1bd   :  { %v924_v47 = vpop.f32.mrf.mxu1  ;;  %s1735_s9 = sshll.u32 %s2358_s11, 4  ;;  %s1736_s9 = int_to_ptr.vmem [resolvable:$true] %s1735_s9 }
 0x1be   :  { %v925_v48 = vadd.f32 %v1795_v39, %v924_v47  ;;  %2206 = vmatprep.mubr.msk.f32.mxu1 %vm1193_vm3, %v985_v26  ;;  %v988_v51 = vmax.f32 %v930_v46, 0.0  ;;  %s2336_s20 = scalar_lea.vmem %s1736_s9, 2048  ;;  %p2341_p1 = scmp.lt.s32.totalorder %s1736_s9, %s1736_s9 }
 0x1bf   :  { %v2160_v49 = vpop.f32.mrf.mxu1  ;;  %2207 = vmatmul.mubr.msk.f32.gmra.mxu1 %vm1193_vm3, %v986_v45  ;;  %p2337_p0 = scmp.ne.s32.totalorder %s1736_s9, %s2336_s20  ;;  %p2342_p2 = scmp.lt.s32.totalorder %s2336_s20, %s2336_s20 }
 0x1c0   :  { %v987_v50 = vmax.f32 %v925_v48, 0.0  ;;  %v940_v28 = vadd.f32 %v2160_v49, %v1795_v39 }
 0x1c1   :  { %v934_v52 = vpop.f32.mrf.mxu1  ;;  %p2343_p3 = por %p2342_p2, %p2341_p1 }
 0x1c2   :  { %v935_v53 = vadd.f32 %v1795_v39, %v934_v52  ;;  %2209 = vmatprep.mubr.msk.f32.mxu1 %vm1193_vm3, %v987_v50  ;;  %v990_v56 = vmax.f32 %v940_v28, 0.0 }
 0x1c3   :  { %v2163_v54 = vpop.f32.mrf.mxu1  ;;  %2210 = vmatmul.mubr.msk.f32.gmra.mxu1 %vm1193_vm3, %v988_v51  ;;  %p2344_p4 = pnand %p2343_p3, %p2337_p0 }
 0x1c4   :  { %v989_v55 = vmax.f32 %v935_v53, 0.0  ;;  %v950_v30 = vadd.f32 %v2163_v54, %v1795_v39 }
 0x1c5   :  { %v944_v57 = vpop.f32.mrf.mxu1 }
 0x1c6   :  { %v945_v58 = vadd.f32 %v1795_v39, %v944_v57  ;;  %2212 = vmatprep.mubr.msk.f32.mxu1 %vm1193_vm3, %v989_v55  ;;  %v992_v61 = vmax.f32 %v950_v30, 0.0 }
 0x1c7   :  { %v2166_v59 = vpop.f32.mrf.mxu1  ;;  %2213 = vmatmul.mubr.msk.f32.gmra.mxu1 %vm1193_vm3, %v990_v56 }
 0x1c8   :  { %v991_v60 = vmax.f32 %v945_v58, 0.0  ;;  %v960_v62 = vadd.f32 %v2166_v59, %v1795_v39 }
 0x1c9   :  { %v954_v63 = vpop.f32.mrf.mxu1 }
 0x1ca   :  { %v955_v0 = vadd.f32 %v1795_v39, %v954_v63  ;;  %2215 = vmatprep.mubr.msk.f32.mxu1 %vm1193_vm3, %v991_v60  ;;  %v994_v2 = vmax.f32 %v960_v62, 0.0 }
 0x1cb   :  { %v2169_v32 = vpop.f32.mrf.mxu1  ;;  %2216 = vmatmul.mubr.msk.f32.gmra.mxu1 %vm1193_vm3, %v992_v61 }
 0x1cc   :  { %v993_v1 = vmax.f32 %v955_v0, 0.0  ;;  %v970_v3 = vadd.f32 %v2169_v32, %v1795_v39 }
 0x1cd   :  { %v964_v4 = vpop.f32.mrf.mxu1 }
 0x1ce   :  { %v965_v34 = vadd.f32 %v1795_v39, %v964_v4  ;;  %2218 = vmatprep.mubr.msk.f32.mxu1 %vm1193_vm3, %v993_v1  ;;  %v996_v7 = vmax.f32 %v970_v3, 0.0 }
 0x1cf   :  { %v2172_v5 = vpop.f32.mrf.mxu1  ;;  %2219 = vmatmul.mubr.msk.f32.gmra.mxu1 %vm1193_vm3, %v994_v2 }
 0x1d0   :  { %v995_v6 = vmax.f32 %v965_v34, 0.0  ;;  %v980_v8 = vadd.f32 %v2172_v5, %v1795_v39 }
 0x1d1   :  { %v974_v9 = vpop.f32.mrf.mxu1 }
 0x1d2   :  { %v975_v10 = vadd.f32 %v1795_v39, %v974_v9  ;;  %2221 = vmatprep.mubr.msk.f32.mxu1 %vm1193_vm3, %v995_v6  ;;  %v998_v12 = vmax.f32 %v980_v8, 0.0  ;;  %v2935_v39 = vpop.f32.mrf.mxu0 }
 0x1d3   :  { %2222 = vmatmul.mubr.msk.f32.gmra.mxu1 %vm1193_vm3, %v996_v7 }
 0x1d4   :  { %v997_v11 = vmax.f32 %v975_v10, 0.0  ;;  %v2231_v29 = vpop.f32.mrf.mxu0 }
 0x1d6   :  { %2224 = vmatprep.mubr.msk.f32.mxu1 %vm1193_vm3, %v997_v11  ;;  %v1501_v31 = vpop.f32.mrf.mxu0 }
 0x1d7   :  { %2225 = vmatmul.mubr.msk.f32.gmra.mxu1 %vm1193_vm3, %v998_v12 }
 0x1d8   :  { %v2234_v33 = vpop.f32.mrf.mxu0 }
 0x1da   :  { %v1511_v35 = vpop.f32.mrf.mxu0 }
 0x1dc   :  { %v2237_v40 = vpop.f32.mrf.mxu0 }
 0x1de   :  { %v1521_v24 = vpop.f32.mrf.mxu0 }
 0x1e0   :  { %v2240_v37 = vpop.f32.mrf.mxu0 }
 0x1e2   :  { %v1531_v43 = vpop.f32.mrf.mxu0 }
 0x1e4   :  { %v2243_v47 = vpop.f32.mrf.mxu0 }
 0x1e6   :  { %v1541_v56 = vpop.f32.mrf.mxu0 }
 0x1e8   :  { %v2246_v32 = vpop.f32.mrf.mxu0 }
 0x1ea   :  { %v1551_v10 = vpop.f32.mrf.mxu0 }
 0x27b   :  { %v2205_v41 = vpop.f32.mrf.mxu1 }
 0x27c   :  { %v1314_v42 = vadd.f32 %v2205_v41, %v2177_v36 }
 0x27d   :  { %v1308_v26 = vpop.f32.mrf.mxu1 }
 0x27e   :  { %v1581_v45 = vadd.f32 %v2231_v29, %v1314_v42  ;;  %v1309_v46 = vadd.f32 %v1308_v26, %v1114_v13 }
 0x27f   :  { %v2208_v48 = vpop.f32.mrf.mxu1 }
 0x280   :  { %v1603_v49 = vadd.f32 %v2940_v44, %v1581_v45  ;;  %v1580_v50 = vadd.f32 %v1501_v31, %v1309_v46  ;;  %v1324_v51 = vadd.f32 %v2208_v48, %v2180_v14  ;;  %v2249_v31 = vpop.f32.mrf.mxu0 }
 0x281   :  { %v1318_v28 = vpop.f32.mrf.mxu1 }
 0x282   :  { %v1862_v52 = vmul.f32 -1.442695, %v1603_v49  ;;  %v1602_v53 = vadd.f32 %v2940_v44, %v1580_v50  ;;  %v1583_v54 = vadd.f32 %v2234_v33, %v1324_v51  ;;  %v1319_v55 = vadd.f32 %v1318_v28, %v1124_v15  ;;  %v1561_v46 = vpop.f32.mrf.mxu0 }
 0x283   :  { %v2211_v30 = vpop.f32.mrf.mxu1 }
 0x284   :  { %2272 = vpow2.f32 %v1862_v52  ;;  %v1861_v57 = vmul.f32 -1.442695, %v1602_v53  ;;  %v1605_v58 = vadd.f32 %v2940_v44, %v1583_v54  ;;  %v1582_v59 = vadd.f32 %v1511_v35, %v1319_v55 }
 0x285   :  { %v1334_v60 = vadd.f32 %v2211_v30, %v2183_v16  ;;  %v1328_v61 = vpop.f32.mrf.mxu1 }
 0x286   :  { %2274 = vpow2.f32 %v1861_v57  ;;  %v1864_v62 = vmul.f32 -1.442695, %v1605_v58  ;;  %v1604_v63 = vadd.f32 %v2940_v44, %v1582_v59  ;;  %v1329_v0 = vadd.f32 %v1328_v61, %v1134_v17  ;;  %v2252_v57 = vpop.f32.mrf.mxu0 }
 0x287   :  { %v1585_v1 = vadd.f32 %v2237_v40, %v1334_v60  ;;  %v2214_v2 = vpop.f32.mrf.mxu1 }
 0x288   :  { %2276 = vpow2.f32 %v1864_v62  ;;  %v1863_v3 = vmul.f32 -1.442695, %v1604_v63  ;;  %v1584_v4 = vadd.f32 %v1521_v24, %v1329_v0  ;;  %v1344_v34 = vadd.f32 %v2214_v2, %v2186_v38 }
 0x289   :  { %v1607_v5 = vadd.f32 %v2940_v44, %v1585_v1  ;;  %v1338_v6 = vpop.f32.mrf.mxu1 }
 0x28a   :  { %2278 = vpow2.f32 %v1863_v3  ;;  %v1606_v7 = vadd.f32 %v2940_v44, %v1584_v4  ;;  %v1587_v8 = vadd.f32 %v2240_v37, %v1344_v34  ;;  %v1339_v9 = vadd.f32 %v1338_v6, %v1144_v18  ;;  %v1571_v34 = vpop.f32.mrf.mxu0 }
 0x28b   :  { %v1866_v11 = vmul.f32 -1.442695, %v1607_v5  ;;  %v2217_v12 = vpop.f32.mrf.mxu1 }
 0x28c   :  { %v1865_v36 = vmul.f32 -1.442695, %v1606_v7  ;;  %v1609_v13 = vadd.f32 %v2940_v44, %v1587_v8  ;;  %v1586_v14 = vadd.f32 %v1531_v43, %v1339_v9  ;;  %v1354_v15 = vadd.f32 %v2217_v12, %v2921_v19 }
 0x28d   :  { %2280 = vpow2.f32 %v1866_v11  ;;  %v1348_v16 = vpop.f32.mrf.mxu1 }
 0x28e   :  { %2282 = vpow2.f32 %v1865_v36  ;;  %v1868_v17 = vmul.f32 -1.442695, %v1609_v13  ;;  %v1608_v38 = vadd.f32 %v2940_v44, %v1586_v14  ;;  %v1589_v29 = vadd.f32 %v2243_v47, %v1354_v15 }
 0x28f   :  { %v1349_v33 = vadd.f32 %v1348_v16, %v2923_v20  ;;  %v2220_v18 = vpop.f32.mrf.mxu1 }
 0x290   :  { %2284 = vpow2.f32 %v1868_v17  ;;  %v1867_v35 = vmul.f32 -1.442695, %v1608_v38  ;;  %v1611_v40 = vadd.f32 %v2940_v44, %v1589_v29  ;;  %v1364_v24 = vadd.f32 %v2220_v18, %v2925_v21 }
 0x291   :  { %v2273_v37 = vpop.eup %2272  ;;  %v1588_v41 = vadd.f32 %v1541_v56, %v1349_v33  ;;  %v1358_v19 = vpop.f32.mrf.mxu1 }
 0x292   :  { %v1667_v42 = vadd.f32 1.0, %v2273_v37  ;;  %2286 = vpow2.f32 %v1867_v35  ;;  %v1870_v43 = vmul.f32 -1.442695, %v1611_v40  ;;  %v1591_v26 = vadd.f32 %v2246_v32, %v1364_v24 }
 0x293   :  { %v2275_v45 = vpop.eup %2274  ;;  %v1610_v47 = vadd.f32 %v2940_v44, %v1588_v41  ;;  %v1359_v20 = vadd.f32 %v1358_v19, %v2927_v22  ;;  %v2223_v48 = vpop.f32.mrf.mxu1 }
 0x294   :  { %2288 = vrcp.f32 %v1667_v42  ;;  %v1666_v49 = vadd.f32 1.0, %v2275_v45  ;;  %v1613_v50 = vadd.f32 %v2940_v44, %v1591_v26  ;;  %v1374_v21 = vadd.f32 %v2223_v48, %v2929_v23 }
 0x295   :  { %v2277_v51 = vpop.eup %2276  ;;  %2290 = vpow2.f32 %v1870_v43  ;;  %v1869_v28 = vmul.f32 -1.442695, %v1610_v47  ;;  %v1590_v52 = vadd.f32 %v1551_v10, %v1359_v20  ;;  %v1368_v53 = vpop.f32.mrf.mxu1 }
 0x296   :  { %2292 = vrcp.f32 %v1666_v49  ;;  %v1669_v54 = vadd.f32 1.0, %v2277_v51  ;;  %v1872_v55 = vmul.f32 -1.442695, %v1613_v50  ;;  %v1593_v56 = vadd.f32 %v2249_v31, %v1374_v21 }
 0x297   :  { %v2279_v30 = vpop.eup %2278  ;;  %2294 = vpow2.f32 %v1869_v28  ;;  %v1612_v22 = vadd.f32 %v2940_v44, %v1590_v52  ;;  %v1369_v58 = vadd.f32 %v1368_v53, %v2931_v25  ;;  %v2226_v59 = vpop.f32.mrf.mxu1 }
 0x298   :  { %2296 = vrcp.f32 %v1669_v54  ;;  %v1668_v60 = vadd.f32 1.0, %v2279_v30  ;;  %v1615_v23 = vadd.f32 %v2940_v44, %v1593_v56  ;;  %v1384_v61 = vadd.f32 %v2226_v59, %v2933_v27 }
 0x299   :  { %2298 = vpow2.f32 %v1872_v55  ;;  %v1871_v62 = vmul.f32 -1.442695, %v1612_v22  ;;  %v1592_v63 = vadd.f32 %v1561_v46, %v1369_v58  ;;  %v1378_v0 = vpop.f32.mrf.mxu1 }
 0x29a   :  { %v2281_v32 = vpop.eup %2280  ;;  %2300 = vrcp.f32 %v1668_v60  ;;  %v1874_v1 = vmul.f32 -1.442695, %v1615_v23  ;;  %v1595_v2 = vadd.f32 %v2252_v57, %v1384_v61  ;;  %v1379_v3 = vadd.f32 %v1378_v0, %v2935_v39 }
 0x29b   :  { %v2283_v4 = vpop.eup %2282  ;;  %v1671_v25 = vadd.f32 1.0, %v2281_v32  ;;  %2302 = vpow2.f32 %v1871_v62  ;;  %v1614_v5 = vadd.f32 %v2940_v44, %v1592_v63 }
 0x29c   :  { %v1670_v6 = vadd.f32 1.0, %v2283_v4  ;;  %2304 = vpow2.f32 %v1874_v1  ;;  %v1617_v27 = vadd.f32 %v2940_v44, %v1595_v2  ;;  %v1594_v7 = vadd.f32 %v1571_v34, %v1379_v3 }
 0x29d   :  { %v2285_v8 = vpop.eup %2284  ;;  %2306 = vrcp.f32 %v1671_v25  ;;  %v1873_v9 = vmul.f32 -1.442695, %v1614_v5 }
 0x29e   :  { %2308 = vrcp.f32 %v1670_v6  ;;  %v1673_v10 = vadd.f32 1.0, %v2285_v8  ;;  %v1876_v11 = vmul.f32 -1.442695, %v1617_v27  ;;  %v1616_v12 = vadd.f32 %v2940_v44, %v1594_v7 }
 0x29f   :  { %v2287_v39 = vpop.eup %2286  ;;  %2310 = vpow2.f32 %v1873_v9 }
 0x2a0   :  { %2312 = vrcp.f32 %v1673_v10  ;;  %v1672_v36 = vadd.f32 1.0, %v2287_v39  ;;  %v1875_v13 = vmul.f32 -1.442695, %v1616_v12 }
 0x2a1   :  { %v2289_v14 = vpop.eup %2288  ;;  %2314 = vpow2.f32 %v1876_v11 }
 0x2a2   :  { %v2291_v15 = vpop.eup %2290  ;;  %1715 = vst [vmem:[#allocation2 + $0x8] sm:$0xff] %v2289_v14  ;;  %2316 = vrcp.f32 %v1672_v36 }
 0x2a3   :  { %v2293_v16 = vpop.eup %2292  ;;  %v1675_v17 = vadd.f32 1.0, %v2291_v15  ;;  %2318 = vpow2.f32 %v1875_v13 }
 0x2a4   :  { %v2295_v38 = vpop.eup %2294  ;;  %1714 = vst [vmem:[#allocation2] sm:$0xff] %v2293_v16 }
 0x2a5   :  { %v2297_v29 = vpop.eup %2296  ;;  %2320 = vrcp.f32 %v1675_v17  ;;  %v1674_v31 = vadd.f32 1.0, %v2295_v38 }
 0x2a6   :  { %v2299_v33 = vpop.eup %2298  ;;  %1717 = vst [vmem:[#allocation2 + $0x18] sm:$0xff] %v2297_v29 }
 0x2a7   :  { %v2301_v44 = vpop.eup %2300  ;;  %2322 = vrcp.f32 %v1674_v31  ;;  %v1677_v18 = vadd.f32 1.0, %v2299_v33 }
 0x2a8   :  { %v2303_v35 = vpop.eup %2302  ;;  %1716 = vst [vmem:[#allocation2 + $0x10] sm:$0xff] %v2301_v44 }
 0x2a9   :  { %v2305_v40 = vpop.eup %2304  ;;  %2324 = vrcp.f32 %v1677_v18  ;;  %v1676_v24 = vadd.f32 1.0, %v2303_v35 }
 0x2aa   :  { %v2307_v37 = vpop.eup %2306  ;;  %v1679_v41 = vadd.f32 1.0, %v2305_v40 }
 0x2ab   :  { %v2309_v19 = vpop.eup %2308  ;;  %1719 = vst [vmem:[#allocation2 + $0x28] sm:$0xff] %v2307_v37  ;;  %2326 = vrcp.f32 %v1676_v24 }
 0x2ac   :  { %v2311_v42 = vpop.eup %2310  ;;  %1718 = vst [vmem:[#allocation2 + $0x20] sm:$0xff] %v2309_v19  ;;  %2328 = vrcp.f32 %v1679_v41 }
 0x2ad   :  { %v2313_v43 = vpop.eup %2312  ;;  %v1678_v26 = vadd.f32 1.0, %v2311_v42 }
 0x2ae   :  { %v2315_v45 = vpop.eup %2314  ;;  %1721 = vst [vmem:[#allocation2 + $0x38] sm:$0xff] %v2313_v43 }
 0x2af   :  { %v2317_v46 = vpop.eup %2316  ;;  %2330 = vrcp.f32 %v1678_v26  ;;  %v1681_v47 = vadd.f32 1.0, %v2315_v45 }
 0x2b0   :  { %v2319_v20 = vpop.eup %2318  ;;  %1720 = vst [vmem:[#allocation2 + $0x30] sm:$0xff] %v2317_v46 }
 0x2b1   :  { %2332 = vrcp.f32 %v1681_v47  ;;  %v1680_v48 = vadd.f32 1.0, %v2319_v20 }
 0x2b2   :  { %v2321_v49 = vpop.eup %2320 }
 0x2b3   :  { %1723 = vst [vmem:[#allocation2 + $0x48] sm:$0xff] %v2321_v49  ;;  %2334 = vrcp.f32 %v1680_v48 }
 0x2b4   :  { %v2323_v50 = vpop.eup %2322 }
 0x2b5   :  { %1722 = vst [vmem:[#allocation2 + $0x40] sm:$0xff] %v2323_v50 }
 0x2b6   :  { %v2325_v21 = vpop.eup %2324 }
 0x2b7   :  { %1725 = vst [vmem:[#allocation2 + $0x58] sm:$0xff] %v2325_v21 }
 0x2b8   :  { %v2327_v51 = vpop.eup %2326 }
 0x2b9   :  { %v2329_v28 = vpop.eup %2328  ;;  %1724 = vst [vmem:[#allocation2 + $0x50] sm:$0xff] %v2327_v51 }
 0x2ba   :  { %1727 = vst [vmem:[#allocation2 + $0x68] sm:$0xff] %v2329_v28 }
 0x2bc   :  { %v2331_v52 = vpop.eup %2330 }
 0x2bd   :  { %1726 = vst [vmem:[#allocation2 + $0x60] sm:$0xff] %v2331_v52 }
 0x2be   :  { %v2333_v53 = vpop.eup %2332 }
 0x2bf   :  { %1729 = vst [vmem:[#allocation2 + $0x78] sm:$0xff] %v2333_v53 }
 0x2c0   :  { %v2335_v54 = vpop.eup %2334 }
 0x2c1   :  { %1728 = vst [vmem:[#allocation2 + $0x70] sm:$0xff] %v2335_v54 }
 0x2c2   :  { %2347 = shalt.err (!%p2344_p4)
}
 0x2c3   :  { %s2359_s21 = smov 128   ;;  %s2360_s22 = smov 8  }
 0x2c4   :  { %1741 = dma.vmem_to_hbm [thread:$0]  %s1736_s9, 2048, %s2981_s12, [#allocation3], %s2359_s21, %s2359_s21, %s2360_s22  }
 0x2c5   :  { %2356 = dma.done.wait [#allocation3], 2048  }
 0x2c6   :  { %2357 = vsyncadd [#allocation3], 4294965248 }
 0x2c7   :  { %1745 = vsyncpa [#allocation3], 1 }

</bundles_post_ra>
